<compile_context>
chip_gen: v5e
topology: v5e:2x2
jax: 0.10.0
libtpu: 0.0.40
codegen_flags: <defaults>
</compile_context>

<pallas_src>
import functools

import jax
import jax.numpy as jnp
from jax.experimental import pallas as pl
from jax.experimental.pallas import tpu as pltpu


def _round_up(x: int, m: int) -> int:
    return ((x + m - 1) // m) * m


# Budget for one grid step: double-buffered streamed inputs + in-kernel temps.
_TILE_BUDGET_BYTES = 16 * 1024 * 1024
# Leading 'parallel' grid axis: uses both TensorCores on v7x, harmless on
# single-TC v5e / v6e (just a 2-iteration outer loop over the same work).
_NUM_CORES = 2


def _choose_batch_tile(B: int, A: int, logits_isz: int, targets_isz: int) -> int:
    # Per batch row: 2x double-buffered streamed inputs plus ~3 f32-wide
    # temporaries (masked logits, int32 index select, misc) in vregs/VMEM.
    per_row = A * (2 * (logits_isz + targets_isz) + 12) + 16
    tb = _TILE_BUDGET_BYTES // max(per_row, 1)
    tb = min(tb, 512)                    # >=512-row tiles are already past the knee
    tb = max((tb // 8) * 8, 8)
    tb = min(tb, _round_up(B, 8))
    return int(tb)


@functools.lru_cache(maxsize=None)
def _vmem_limit_bytes() -> int:
    try:
        cap = int(pltpu.get_tpu_info().vmem_capacity_bytes)
    except Exception:
        cap = 64 * 1024 * 1024           # v7x per-TC VMEM (the smallest)
    return int(min(cap - 16 * 1024 * 1024, 64 * 1024 * 1024))


def _make_kernel(target_type: str, acc_threshold: float, B: int, TB: int):
    """Fused, batch-tiled loss kernel.  Per-core partial sums (unscaled)."""

    def kernel(logits_ref, targets_ref, conf_ref, out_ref):
        c = pl.program_id(0)             # core / outer split
        i = pl.program_id(1)             # batch-block step within the split

        @pl.when(i == 0)
        def _():
            out_ref[...] = jnp.zeros_like(out_ref)

        logits = logits_ref[...]                      # (TB, A), native dtype
        targets = targets_ref[...]                    # (TB, A), native dtype
        conf = conf_ref[...].astype(jnp.float32)      # (TB, 2)
        tb, a = logits.shape

        col = jax.lax.broadcasted_iota(jnp.int32, (1, a), 1)          # (1, A)
        # Un-clamped logical batch-block index (the index_map clamps; any
        # duplicate trailing blocks are zeroed here via the row < B mask).
        blk = c * pl.num_programs(1) + i
        row = jax.lax.broadcasted_iota(jnp.int32, (tb, 1), 0) + blk * TB
        valid = row < B                                               # (TB, 1)

        # pred_inds = argmax over answers excluding unk (col 0).  Softmax +
        # renormalize is order-preserving, so argmax on the masked raw logits
        # matches torch.argmax(_masked_unk_softmax(logits)) exactly (first
        # occurrence on ties).  Exact in the native (possibly bf16) dtype.
        neg = jnp.asarray(-jnp.inf, logits.dtype)
        masked = jnp.where(col > 0, logits, neg)
        mx = jnp.max(masked, axis=1, keepdims=True)
        pred_inds = jnp.min(jnp.where(masked == mx, col, a),
                            axis=1, keepdims=True)                    # (TB, 1)

        conf0 = conf[:, 0:1]                                          # (TB, 1)
        conf1 = conf[:, 1:2]                                          # (TB, 1)

        if target_type == 'max_ind':
            tmx = jnp.max(targets, axis=1, keepdims=True)
            tgt_inds = jnp.min(jnp.where(targets == tmx, col, a),
                               axis=1, keepdims=True)
            correct = pred_inds == tgt_inds                           # (TB, 1)
        else:
            # targets[b, pred_inds[b]] gathered as a masked row-sum (single
            # nonzero element per row -> exact in bf16); upcast the result.
            zero = jnp.zeros((), targets.dtype)
            tgt_scores = jnp.sum(jnp.where(col == pred_inds, targets, zero),
                                 axis=1, keepdims=True).astype(jnp.float32)
            if 'regress' in target_type:
                c0 = 1.0 - tgt_scores
                c1 = tgt_scores
            else:                                                     # 'threshold'
                correct = tgt_scores >= acc_threshold

        if target_type == 'regress_bce':
            # nn.BCELoss(reduction='mean')(conf, [1-s, s]) * 2 ; log clamped
            # at -100 like torch.  (Wrapper applies the 1/B scale.)
            logp0 = jnp.maximum(jnp.log(conf0), -100.0)
            logp1 = jnp.maximum(jnp.log(conf1), -100.0)
            log1m0 = jnp.maximum(jnp.log(1.0 - conf0), -100.0)
            log1m1 = jnp.maximum(jnp.log(1.0 - conf1), -100.0)
            per = (-(c0 * logp0 + (1.0 - c0) * log1m0)
                   - (c1 * logp1 + (1.0 - c1) * log1m1))
        elif target_type == 'regress_mse':
            per = (conf0 - c0) ** 2 + (conf1 - c1) ** 2
        elif target_type == 'regress_l1':
            per = jnp.abs(conf0 - c0) + jnp.abs(conf1 - c1)
        else:
            # CrossEntropyLoss(weight=[1,1]) over 2-class confidence logits:
            # logsumexp(conf) - conf[correct]; 2-class logsumexp written as
            # max + log1p(exp(-|diff|))  (one exp + one log).
            cm = jnp.maximum(conf0, conf1)
            lse = cm + jnp.log1p(jnp.exp(-jnp.abs(conf0 - conf1)))
            picked = jnp.where(correct, conf1, conf0)
            per = lse - picked

        per = jnp.where(valid, per, 0.0)              # drop OOB / dup rows
        out_ref[...] += jnp.sum(per, axis=0, keepdims=True)   # (1,1) -> (8,128)

    return kernel


@functools.partial(jax.jit, static_argnames=('target_type', 'acc_threshold'))
def correctness_prediction_loss(logits, targets, confidences, *,
                                target_type='threshold', acc_threshold=0.5):
    """JAX/Pallas equivalent of CorrectnessPredictionLoss.forward."""
    assert target_type in ('threshold', 'max_ind', 'regress_bce',
                           'regress_mse', 'regress_l1')
    if logits.ndim == 3:                 # logits[:, 0] when 3-D
        logits = logits[:, 0]
    B, A = logits.shape

    TB = _choose_batch_tile(B, A, logits.dtype.itemsize, targets.dtype.itemsize)
    b_blocks = -(-B // TB)                       # ceil(B / TB)
    steps = -(-b_blocks // _NUM_CORES)           # batch blocks per core

    def row_map(c, i):
        # Clamp so the DMA never targets a block past the array end; the
        # kernel's row-mask zeroes the contribution of any duplicated block.
        return (jnp.minimum(c * steps + i, b_blocks - 1), 0)

    if target_type == 'regress_bce':
        n_transc = 4 * B
    elif 'regress' in target_type:
        n_transc = 0
    else:
        n_transc = 2 * B
    cost = pl.CostEstimate(
        flops=10 * B * A,
        transcendentals=n_transc,
        bytes_accessed=(B * A * (logits.dtype.itemsize + targets.dtype.itemsize)
                        + B * 2 * confidences.dtype.itemsize
                        + _NUM_CORES * 8 * 128 * 4),
    )

    kernel = _make_kernel(target_type, float(acc_threshold), B, TB)
    out = pl.pallas_call(
        kernel,
        # One lane-dense (8,128) accumulator block per core; out[8c, 0] holds
        # core c's unscaled partial sum.
        out_shape=jax.ShapeDtypeStruct((_NUM_CORES * 8, 128), jnp.float32),
        grid_spec=pltpu.PrefetchScalarGridSpec(
            num_scalar_prefetch=0,
            grid=(_NUM_CORES, steps),
            in_specs=[pl.BlockSpec((TB, A), row_map),
                      pl.BlockSpec((TB, A), row_map),
                      pl.BlockSpec((TB, 2), row_map)],
            out_specs=pl.BlockSpec((8, 128), lambda c, i: (c, 0)),
        ),
        compiler_params=pltpu.CompilerParams(
            dimension_semantics=('parallel', 'arbitrary'),
            vmem_limit_bytes=_vmem_limit_bytes(),
        ),
        cost_estimate=cost,
    )(logits, targets, confidences)

    partials = out[::8, 0]                       # (NUM_CORES,)
    if target_type in ('regress_mse', 'regress_l1'):
        scale = 1.0 / (2 * B)                    # mean over B*2 elements
    else:
        scale = 1.0 / B                          # CE mean / BCE(mean)*2
    return jnp.sum(partials) * scale


# ---------------------------------------------------------------------------
# Pure-JAX reference (mirrors the PyTorch module) for correctness checking.
# ---------------------------------------------------------------------------
def _reference_loss(logits, targets, conf, target_type, t):
    logits = logits.astype(jnp.float32)
    targets = targets.astype(jnp.float32)
    conf = conf.astype(jnp.float32)
    if logits.ndim == 3:
        logits = logits[:, 0]
    sm = jax.nn.softmax(logits, axis=1)
    sm = sm.at[:, 0].set(0.0)
    sm = sm / jnp.sum(sm, axis=1, keepdims=True)
    pred = jnp.argmax(sm, axis=1)
    if target_type == 'max_ind':
        tgt = jnp.argmax(targets, axis=1)
        correct = (pred == tgt).astype(jnp.int32)
    else:
        oh = jax.nn.one_hot(pred, logits.shape[1], dtype=targets.dtype)
        ts = jnp.sum(oh * targets, axis=1)
        if 'regress' in target_type:
            corr = jnp.stack([1.0 - ts, ts], axis=1)
        else:
            correct = (ts >= t).astype(jnp.int32)
    if target_type == 'regress_bce':
        logp = jnp.maximum(jnp.log(conf), -100.0)
        log1m = jnp.maximum(jnp.log(1.0 - conf), -100.0)
        per = -(corr * logp + (1.0 - corr) * log1m)
        return jnp.mean(per) * 2.0
    if target_type == 'regress_mse':
        return jnp.mean((conf - corr) ** 2)
    if target_type == 'regress_l1':
        return jnp.mean(jnp.abs(conf - corr))
    lse = jax.scipy.special.logsumexp(conf, axis=1)
    picked = jnp.take_along_axis(conf, correct[:, None], axis=1)[:, 0]
    return jnp.mean(lse - picked)


if __name__ == "__main__":
    key = jax.random.PRNGKey(0)
    B, A = 10, 32                        # non-multiple-of-8 batch exercises masking
    k1, k2, k3 = jax.random.split(key, 3)

    logits = jax.random.normal(k1, (B, A), dtype=jnp.float32)        # answer scores
    targets = jax.random.uniform(k2, (B, A), dtype=jnp.float32)      # per-answer accuracies
    conf_logits = jax.random.normal(k3, (B, 2), dtype=jnp.float32)   # 2-class logits
    conf_probs = jax.nn.sigmoid(conf_logits)                         # probs for BCE path

    cases = [('threshold', conf_logits), ('max_ind', conf_logits),
             ('regress_bce', conf_probs), ('regress_mse', conf_logits),
             ('regress_l1', conf_logits)]

    ok = True
    for tt, conf in cases:
        got = correctness_prediction_loss(logits, targets, conf,
                                          target_type=tt, acc_threshold=0.5)
        want = _reference_loss(logits, targets, conf, tt, 0.5)
        got, want = jax.block_until_ready((got, want))
        if not jnp.allclose(got, want, rtol=1e-4, atol=1e-4):
            ok = False
            print(f"MISMATCH {tt}: kernel={float(got)} ref={float(want)}")

    # bf16 inputs stream at half the HBM bytes; the hot tile math stays bf16.
    bf16_loss = correctness_prediction_loss(
        logits.astype(jnp.bfloat16), targets.astype(jnp.bfloat16),
        conf_logits, target_type='threshold', acc_threshold=0.5)
    jax.block_until_ready(bf16_loss)

    if ok:
        print("KERNEL_OK")
</pallas_src>

<mosaic_0001>
module attributes {stable_mosaic.version = 11 : i64} {
  func.func @kernel(%arg0: i32, %arg1: i32, %arg2: memref<16x32xf32, #tpu.memory_space<vmem>>, %arg3: memref<16x32xf32, #tpu.memory_space<vmem>>, %arg4: memref<16x2xf32, #tpu.memory_space<vmem>>, %arg5: memref<8x128xf32, #tpu.memory_space<vmem>>) attributes {dimension_semantics = [#tpu.dimension_semantics<parallel>, #tpu.dimension_semantics<arbitrary>], iteration_bounds = array<i64: 2, 1>, scalar_prefetch = 0 : i64, scratch_operands = 0 : i64, tpu.core_type = #tpu.core_type<tc>, window_params = [{transform_indices = @transform_0, window_bounds = array<i64: 16, 32>}, {transform_indices = @transform_1, window_bounds = array<i64: 16, 32>}, {transform_indices = @transform_2, window_bounds = array<i64: 16, 2>}, {transform_indices = @transform_3, window_bounds = array<i64: 8, 128>}]} {
    %c0_i32 = arith.constant 0 : i32
    %0 = arith.cmpi eq, %arg1, %c0_i32 : i32
    %1 = arith.extui %0 : i1 to i32
    %c0_i32_0 = arith.constant 0 : i32
    %2 = arith.cmpi ne, %1, %c0_i32_0 : i32
    scf.if %2 {
      %cst_19 = arith.constant 0.000000e+00 : f32
      %60 = vector.broadcast %cst_19 : f32 to vector<8x128xf32>
      %c0_20 = arith.constant 0 : index
      %c0_21 = arith.constant 0 : index
      %61 = vector.load %arg5[%c0_20, %c0_21] : memref<8x128xf32, #tpu.memory_space<vmem>>, vector<8x128xf32>
      tpu.vector_store %arg5[%c0_20, %c0_21], %60 {strides = array<i32>} : memref<8x128xf32, #tpu.memory_space<vmem>>, vector<8x128xf32>,
    } else {
    }
    %c0 = arith.constant 0 : index
    %c0_1 = arith.constant 0 : index
    %3 = vector.load %arg2[%c0, %c0_1] : memref<16x32xf32, #tpu.memory_space<vmem>>, vector<16x32xf32>
    %c0_2 = arith.constant 0 : index
    %c0_3 = arith.constant 0 : index
    %4 = vector.load %arg3[%c0_2, %c0_3] : memref<16x32xf32, #tpu.memory_space<vmem>>, vector<16x32xf32>
    %c0_4 = arith.constant 0 : index
    %c0_5 = arith.constant 0 : index
    %5 = vector.load %arg4[%c0_4, %c0_5] : memref<16x2xf32, #tpu.memory_space<vmem>>, vector<16x2xf32>
    %6 = tpu.iota {dimensions = array<i32: 1>} : vector<1x32xi32>
    %c1_i32 = arith.constant 1 : i32
    %7 = arith.muli %arg0, %c1_i32 : i32
    %8 = arith.addi %7, %arg1 : i32
    %9 = tpu.iota {dimensions = array<i32: 0>} : vector<16x1xi32>
    %c16_i32 = arith.constant 16 : i32
    %10 = arith.muli %8, %c16_i32 : i32
    %11 = vector.broadcast %10 : i32 to vector<16x1xi32>
    %12 = arith.addi %9, %11 : vector<16x1xi32>
    %c10_i32 = arith.constant 10 : i32
    %13 = vector.broadcast %c10_i32 : i32 to vector<16x1xi32>
    %14 = arith.cmpi slt, %12, %13 : vector<16x1xi32>
    %c0_i32_6 = arith.constant 0 : i32
    %15 = vector.broadcast %c0_i32_6 : i32 to vector<1x32xi32>
    %16 = arith.cmpi sgt, %6, %15 : vector<1x32xi32>
    %cst = arith.constant 0xFF800000 : f32
    %17 = vector.shape_cast %16 : vector<1x32xi1> to vector<1x32xi1>
    %18 = vector.broadcast %17 : vector<1x32xi1> to vector<16x32xi1>
    %19 = vector.broadcast %cst : f32 to vector<16x32xf32>
    %20 = arith.select %18, %3, %19 : vector<16x32xi1>, vector<16x32xf32>
    %cst_7 = arith.constant dense<0xFF800000> : vector<16xf32>
    %21 = vector.multi_reduction <maximumf>, %20, %cst_7 [1] : vector<16x32xf32> to vector<16xf32>
    %22 = vector.shape_cast %21 : vector<16xf32> to vector<16x1xf32>
    %23 = vector.broadcast %22 : vector<16x1xf32> to vector<16x32xf32>
    %24 = arith.cmpf oeq, %20, %23 : vector<16x32xf32>
    %c32_i32 = arith.constant 32 : i32
    %25 = vector.shape_cast %6 : vector<1x32xi32> to vector<1x32xi32>
    %26 = vector.broadcast %25 : vector<1x32xi32> to vector<16x32xi32>
    %27 = vector.broadcast %c32_i32 : i32 to vector<16x32xi32>
    %28 = arith.select %24, %26, %27 : vector<16x32xi1>, vector<16x32xi32>
    %cst_8 = arith.constant dense<2147483647> : vector<16xi32>
    %29 = vector.multi_reduction <minsi>, %28, %cst_8 [1] : vector<16x32xi32> to vector<16xi32>
    %30 = vector.shape_cast %29 : vector<16xi32> to vector<16x1xi32>
    %31 = vector.extract_strided_slice %5 {offsets = [0, 0], sizes = [16, 1], strides = [1, 1]} : vector<16x2xf32> to vector<16x1xf32>
    %32 = vector.extract_strided_slice %5 {offsets = [0, 1], sizes = [16, 1], strides = [1, 1]} : vector<16x2xf32> to vector<16x1xf32>
    %33 = vector.broadcast %6 : vector<1x32xi32> to vector<16x32xi32>
    %34 = vector.broadcast %30 : vector<16x1xi32> to vector<16x32xi32>
    %35 = arith.cmpi eq, %33, %34 : vector<16x32xi32>
    %cst_9 = arith.constant 0.000000e+00 : f32
    %36 = vector.broadcast %cst_9 : f32 to vector<16x32xf32>
    %37 = arith.select %35, %4, %36 : vector<16x32xi1>, vector<16x32xf32>
    %cst_10 = arith.constant dense<0.000000e+00> : vector<16xf32>
    %38 = vector.multi_reduction <add>, %37, %cst_10 [1] : vector<16x32xf32> to vector<16xf32>
    %39 = vector.shape_cast %38 : vector<16xf32> to vector<16x1xf32>
    %cst_11 = arith.constant 5.000000e-01 : f32
    %40 = vector.broadcast %cst_11 : f32 to vector<16x1xf32>
    %41 = arith.cmpf oge, %39, %40 : vector<16x1xf32>
    %42 = arith.maximumf %31, %32 : vector<16x1xf32>
    %43 = arith.subf %31, %32 : vector<16x1xf32>
    %44 = math.absf %43 : vector<16x1xf32>
    %cst_12 = arith.constant 0.000000e+00 : f32
    %45 = vector.broadcast %cst_12 : f32 to vector<16x1xf32>
    %46 = arith.subf %45, %44 : vector<16x1xf32>
    %47 = math.exp %46 : vector<16x1xf32>
    %48 = math.log1p %47 : vector<16x1xf32>
    %49 = arith.addf %42, %48 : vector<16x1xf32>
    %50 = arith.select %41, %32, %31 : vector<16x1xi1>, vector<16x1xf32>
    %51 = arith.subf %49, %50 : vector<16x1xf32>
    %cst_13 = arith.constant 0.000000e+00 : f32
    %52 = vector.broadcast %cst_13 : f32 to vector<16x1xf32>
    %53 = arith.select %14, %51, %52 : vector<16x1xi1>, vector<16x1xf32>
    %c0_14 = arith.constant 0 : index
    %c0_15 = arith.constant 0 : index
    %54 = vector.load %arg5[%c0_14, %c0_15] : memref<8x128xf32, #tpu.memory_space<vmem>>, vector<8x128xf32>
    %cst_16 = arith.constant dense<0.000000e+00> : vector<1xf32>
    %55 = vector.multi_reduction <add>, %53, %cst_16 [0] : vector<16x1xf32> to vector<1xf32>
    %56 = vector.shape_cast %55 : vector<1xf32> to vector<1x1xf32>
    %57 = vector.broadcast %56 : vector<1x1xf32> to vector<8x128xf32>
    %58 = arith.addf %54, %57 : vector<8x128xf32>
    %c0_17 = arith.constant 0 : index
    %c0_18 = arith.constant 0 : index
    %59 = vector.load %arg5[%c0_17, %c0_18] : memref<8x128xf32, #tpu.memory_space<vmem>>, vector<8x128xf32>
    tpu.vector_store %arg5[%c0_17, %c0_18], %58 {strides = array<i32>} : memref<8x128xf32, #tpu.memory_space<vmem>>, vector<8x128xf32>,
    return
  }
  func.func @transform_0(%arg0: i32, %arg1: i32) -> (i32, i32) {
    %c1_i32 = arith.constant 1 : i32
    %0 = arith.muli %arg0, %c1_i32 : i32
    %1 = arith.addi %0, %arg1 : i32
    %c0_i32 = arith.constant 0 : i32
    %2 = arith.minsi %1, %c0_i32 : i32
    %c0_i32_0 = arith.constant 0 : i32
    %c0_i32_1 = arith.constant 0 : i32
    return %2, %c0_i32_0 : i32, i32
  }
  func.func @transform_1(%arg0: i32, %arg1: i32) -> (i32, i32) {
    %c1_i32 = arith.constant 1 : i32
    %0 = arith.muli %arg0, %c1_i32 : i32
    %1 = arith.addi %0, %arg1 : i32
    %c0_i32 = arith.constant 0 : i32
    %2 = arith.minsi %1, %c0_i32 : i32
    %c0_i32_0 = arith.constant 0 : i32
    %c0_i32_1 = arith.constant 0 : i32
    return %2, %c0_i32_0 : i32, i32
  }
  func.func @transform_2(%arg0: i32, %arg1: i32) -> (i32, i32) {
    %c1_i32 = arith.constant 1 : i32
    %0 = arith.muli %arg0, %c1_i32 : i32
    %1 = arith.addi %0, %arg1 : i32
    %c0_i32 = arith.constant 0 : i32
    %2 = arith.minsi %1, %c0_i32 : i32
    %c0_i32_0 = arith.constant 0 : i32
    %c0_i32_1 = arith.constant 0 : i32
    return %2, %c0_i32_0 : i32, i32
  }
  func.func @transform_3(%arg0: i32, %arg1: i32) -> (i32, i32) {
    %c0_i32 = arith.constant 0 : i32
    %c0_i32_0 = arith.constant 0 : i32
    return %arg0, %c0_i32 : i32, i32
  }
}

</mosaic_0001>

<bundles_post_ra>
// kernel: correctness_prediction_loss.1
= control target key start
LH: loop header
LB: loop body
LE: loop exit
PB: predicated region body
PF: predicated region fallthrough
CT: control target
= control target key end

     0   :  { %8 = vsyncpa [#allocation3], 0  ;;  %s880_s0 = inlined_call_operand.vmem [shape: f32[10,32], index: 0, kind: input, shape index: {}]   ;;  %s881_s1 = inlined_call_operand.hbm [shape: f32[10,32], index: 1, kind: input, shape index: {}]   ;;  %s882_s2 = inlined_call_operand.vmem [shape: f32[10,2], index: 2, kind: input, shape index: {}]   ;;  %s883_s3 = inlined_call_operand.vmem [shape: f32[16,128], index: 3, kind: output, shape index: {}]  }
   0x1   :  { %10 = vsyncpa [#allocation3 + $0x1], 0  ;;  %s752_s12 = smov 0   ;;  %s754_s13 = smov 0  }
   0x2   :  { %s756_s14 = smov 0   ;;  %s758_s15 = smov 0  }
   0x3   :  { %s760_s16 = smov 0  }
   0x4 LB: > { %s558_s17 = sadd.s32 4294967295, %s724_s16   ;;  %s28_s18 = sadd.s32 1, %s720_s15  ;;  %s724_s16 = sphi %s760_s16, %s16_s16   ;;  %s720_s15 = sphi %s758_s15, %s888_s15   ;;  %s716_s14 = sphi %s756_s14, %s887_s14   ;;  %s712_s13 = sphi %s754_s13, %s870_s13   ;;  %s708_s12 = sphi %s752_s12, %s886_s12  }
   0x5   : > { %p30_p0 = scmp.ge.s32.totalorder %s28_s18, 2  ;;  %p705_p1 = scmp.ne.s32.totalorder %s712_s13, 0 }
   0x6   : > { %p81_p2 = scmp.eq.s32.totalorder %s724_s16, 0  ;;  %p86_p3 = scmp.ne.s32.totalorder %s712_s13, %s708_s12 }
   0x7   : > { %s890_s18 = smov (%p30_p0, %s28_s18), 0  ;;  %p87_p4 = scmp.eq.s32.totalorder %s558_s17, 0 }
   0x8   : > { %p82_p5 = por %p705_p1, %p81_p2  ;;  %p582_p7 = scmp.lt.s32.totalorder %s724_s16, 2 }
   0x9   : > { %p782_p6 = por %p87_p4, %p86_p3  ;;  %s196_s22 = sshll.u32 %s881_s1, 4  ;;  %s197_s22 = int_to_ptr.hbm [resolvable:$true] %s196_s22 }
   0xa   : > { %s726_s23 = smov [#allocation2]   ;;  %p790_p8 = pnand %p582_p7, %p82_p5 }
   0xb   : > { %s198_s24 = sshll.u32 %s726_s23, 4  ;;  %p565_p9 = scmp.ge.s32.totalorder %s724_s16, 1  ;;  %s199_s24 = int_to_ptr.vmem [resolvable:$true] %s198_s24 }
   0xc   : > { %p221_p10 = scmp.lt.s32.totalorder %s724_s16, 3  ;;  %s647_s26 = sshra.s32 %s197_s22, 4  ;;  %s648_s26 = int_to_ptr.hbm [resolvable:$true] %s647_s26 }
   0xd   : > { %s649_s27 = scalar_lea.hbm %s648_s26, 16  ;;  %p651_p12 = pneg %p790_p8 }
   0xe   : > { %p650_p11 = scmp.ne.s32.totalorder %s648_s26, %s649_s27  ;;  %s654_s30 = scalar_lea.hbm %s881_s1, 16 }
   0xf   : > { %p656_p1 = scmp.lt.s32.totalorder %s654_s30, %s649_s27 }
  0x10   : > { %p652_p13 = pnand %p651_p12, %p650_p11 }
  0x12   : > { %p653_p0 = pneg %p652_p13 }
  0x14   : > { %p658_p2 = pnand %p656_p1, %p653_p0 }
  0x16   : > { %661 = shalt.err (!%p658_p2)
}
  0x17   : > { %s727_s4 = smov 128   ;;  %s728_s5 = smov 8  }
  0x18   : > { %581 = dma.hbm_to_vmem [thread:$0]  (!%p790_p8), %s197_s22, 256, %s199_s24, [#allocation3], %s727_s4, %s727_s4, %s728_s5  }
  0x19   : > { %p222_p3 = pnand %p565_p9, %p221_p10 }
  0x1a   : > { %s227_s6 = sand.u32 (!%p222_p3), 1, %s712_s13  }
  0x1b   : > { %225 = sbr.rel (%p222_p3) target bundleno = 777 (0x309), region = 32  ;;  %s808_s7 = sshll.u32 (!%p222_p3), %s227_s6, 4 }
  0x1c   : > { %s228_s8 = scalar_lea.sflag (!%p222_p3), [#allocation3], %s227_s6  ;;  %s231_s9 = scalar_lea.vmem (!%p222_p3), [#allocation2], %s808_s7 }
  0x20   : > { %702 = dma.done.wait (%p782_p6), %s228_s8, 256  }
  0x21   : > { %704 = vsyncadd (%p782_p6), %s228_s8, 4294967040  ;;  %p271_p4 = scmp.lt.s32.totalorder %s716_s14, 0  ;;  %v313_v0 = vlaneseq  ;;  %vm330_vm1 = vcmask 261120   ;;  %s729_s24 = smov 1   ;;  %v309_v33 = vld [vmem:[%s231_s9] sm:$0xff]  ;;  %v310_v41 = vld [vmem:[%s231_s9 + $0x8] sm:$0xff] }
  0x22   : > { %s730_s25 = smov 127   ;;  %v731_v63 = vmov 0   ;;  %s572_s26 = sshll.u32 %s716_s14, 4  ;;  %vm444_vm14 = vcmask 7168  }
  0x23   : > { %s272_s10 = scalar_select %p271_p4, %s716_s14, 0  ;;  %v818_v1 = vand.u32 127, %v313_v0  ;;  %637 = vset.pattern.permute.xlu1 %v731_v63  ;;  %638 = vset.pattern.permute.xlu0 %v731_v63 }
  0x24   : > { %p298_p6 = scmp.lt.s32.totalorder %s716_s14, 1 }
  0x25   : > { %s567_s11 = sshll.u32 %s272_s10, 1  ;;  %vm325_vm0 = vcmp.gt.s32.totalorder %v818_v1, 0 }
  0x26   : > { %p274_p5 = scmp.lt.s32.totalorder %s567_s11, 1  ;;  %s894_s14 = smov (!%p298_p6, %s716_s14), 1 }
  0x27   : > { %s571_s27 = sshll.u32 %s894_s14, 3 }
  0x28   : > { %s892_s11 = smov (!%p274_p5, %s567_s11), 1  ;;  %s301_s30 = scalar_lea.vmem %s883_s3, %s571_s27 }
  0x29   : > { %s568_s12 = sshll.u32 %s892_s11, 3 }
  0x2a   : > { %s277_s21 = scalar_lea.vmem %s880_s0, %s568_s12  ;;  %s293_s23 = scalar_lea.vmem %s882_s2, %s568_s12 }
  0x2b   : > { %v307_v2 = vld [vmem:[%s277_s21] sm:$0xff]  ;;  %v308_v5 = vld [vmem:[%s277_s21 + $0x8] sm:$0xff] }
  0x2c   : > { %v328_v3 = vsel %vm325_vm0, %v307_v2, -inf  ;;  %v329_v6 = vsel %vm325_vm0, %v308_v5, -inf  ;;  %v833_v18 = vld [vmem:[%s293_s23 + $0x8] sm:$0xff]  ;;  %v836_v27 = vld [vmem:[%s293_s23] sm:$0xff] }
  0x2d   : > { %v331_v4 = vsel %vm330_vm1, %v328_v3, -inf  ;;  %v334_v7 = vsel %vm330_vm1, %v329_v6, -inf }
  0x2e   : > { %332 = vmax.xlane.f32.xlu0 %v331_v4 }
  0x36   : > { %335 = vmax.xlane.f32.xlu0 %v334_v7  ;;  %v317_v7 = vshrl.u32 %v313_v0, 7 }
  0x4a   : > { %425 = vrot.lane.b32.xlu0 %v833_v18, %s729_s24 }
  0xa1   : > { %v333_v8 = vpop.xlane.xlu0 %332 }
  0xa2   : > { %vm337_vm2 = vcmp.eq.f32.partialorder %v328_v3, %v333_v8 }
  0xa3   : > { %v339_v9 = vsel %vm337_vm2, %v818_v1, 32 }
  0xa4   : > { %v341_v10 = vsel %vm330_vm1, %v339_v9, 2147483647 }
  0xa5   : > { %v343_v11 = vshra.s32 %v341_v10, 16  ;;  %v342_v19 = vand.u32 65535, %v341_v10 }
  0xa7   : > { %v345_v12 = vcvt.s32.f32 %v343_v11  ;;  %v344_v21 = vcvt.s32.f32 %v342_v19 }
  0xa9   : > { %346 = vmin.xlane.f32.xlu1 %v345_v12  ;;  %v336_v13 = vpop.xlane.xlu0 %335 }
  0xaa   : > { %vm338_vm3 = vcmp.eq.f32.partialorder %v329_v6, %v336_v13  ;;  %v318_v13 = vadd.s32 8, %v317_v7 }
  0xab   : > { %v340_v14 = vsel %vm338_vm3, %v818_v1, 32 }
  0xac   : > { %v356_v15 = vsel %vm330_vm1, %v340_v14, 2147483647 }
  0xad   : > { %v358_v16 = vshra.s32 %v356_v15, 16  ;;  %v357_v23 = vand.u32 65535, %v356_v15  ;;  %v320_v15 = vstv %s572_s26 }
  0xaf   : > { %v360_v17 = vcvt.s32.f32 %v358_v16  ;;  %v359_v25 = vcvt.s32.f32 %v357_v23  ;;  %v321_v23 = vadd.s32 %v320_v15, %v317_v7 }
  0xb1   : > { %361 = vmin.xlane.f32.xlu1 %v360_v17  ;;  %vm323_vm13 = vcmp.lt.s32.totalorder %v321_v23, 10 }
  0xbc   : > { %v426_v44 = vpop.permute.xlu0 %425 }
 0x11c   : > { %v347_v20 = vpop.xlane.xlu1 %346 }
 0x11d   : > { %vm348_vm4 = vcmp.eq.f32.partialorder %v345_v12, %v347_v20  ;;  %v353_v28 = vcvt.f32.s32 %v347_v20  ;;  %v322_v20 = vadd.s32 %v320_v15, %v318_v13 }
 0x11e   : > { %v349_v22 = vsel %vm348_vm4, %v344_v21, inf }
 0x11f   : > { %350 = vmin.xlane.f32.xlu2 %v349_v22  ;;  %v354_v30 = vshll.u32 %v353_v28, 16  ;;  %vm324_vm12 = vcmp.lt.s32.totalorder %v322_v20, 10 }
 0x124   : > { %v362_v24 = vpop.xlane.xlu1 %361 }
 0x125   : > { %vm363_vm5 = vcmp.eq.f32.partialorder %v360_v17, %v362_v24  ;;  %v368_v34 = vcvt.f32.s32 %v362_v24 }
 0x126   : > { %v364_v26 = vsel %vm363_vm5, %v359_v25, inf }
 0x127   : > { %365 = vmin.xlane.f32.xlu2 %v364_v26  ;;  %v369_v38 = vshll.u32 %v368_v34, 16 }
 0x13f   : > { %423 = vrot.lane.b32.xlu2 %v836_v27, %s729_s24 }
 0x147   : > { %387 = vrot.lane.b32.xlu2 %v833_v18, %s730_s25 }
 0x192   : > { %v351_v29 = vpop.xlane.xlu2 %350 }
 0x193   : > { %v352_v31 = vcvt.f32.s32 %v351_v29 }
 0x195   : > { %v355_v32 = vadd.s32 %v354_v30, %v352_v31 }
 0x197   : > { %vm371_vm6 = vcmp.eq.s32.totalorder %v818_v1, %v355_v32 }
 0x198   : > { %v373_v35 = vsel %vm371_vm6, %v309_v33, 0.0 }
 0x199   : > { %v375_v36 = vsel %vm330_vm1, %v373_v35, 0.0 }
 0x19a   : > { %376 = vadd.xlane.f32.xlu0 %v375_v36  ;;  %v366_v37 = vpop.xlane.xlu2 %365 }
 0x19b   : > { %v367_v39 = vcvt.f32.s32 %v366_v37 }
 0x19d   : > { %v370_v40 = vadd.s32 %v369_v38, %v367_v39 }
 0x19f   : > { %vm372_vm7 = vcmp.eq.s32.totalorder %v818_v1, %v370_v40 }
 0x1a0   : > { %v374_v42 = vsel %vm372_vm7, %v310_v41, 0.0 }
 0x1a1   : > { %v378_v43 = vsel %vm330_vm1, %v374_v42, 0.0 }
 0x1a2   : > { %379 = vadd.xlane.f32.xlu1 %v378_v43  ;;  %v424_v45 = vpop.permute.xlu2 %423 }
 0x1aa   : > { %v388_v50 = vpop.permute.xlu2 %387 }
 0x1ab   : > { %v394_v51 = vsub.f32 %v833_v18, %v388_v50  ;;  %v392_v14 = vmax.f32 %v833_v18, %v388_v50 }
 0x1ad   : > { %v396_v54 = vand.u32 2147483647, %v394_v51 }
 0x1af   : > { %v398_v56 = vsub.f32 0.0, %v396_v54 }
 0x1b1   : > { %v401_v58 = vmul.f32 1.442695, %v398_v56 }
 0x1b3   : > { %639 = vpow2.f32 %v401_v58 }
 0x1b9   : > { %v640_v60 = vpop.eup %639 }
 0x1ba   : > { %v412_v61 = vadd.f32 1.0, %v640_v60  ;;  %v415_v2 = vmul.f32 -0.5, %v640_v60  ;;  %v418_v6 = vand.u32 2147483647, %v640_v60 }
 0x1bb   : > { %385 = vrot.lane.b32.xlu1 %v836_v27, %s730_s25 }
 0x1bc   : > { %v416_v3 = vadd.f32 1.0, %v415_v2  ;;  %vm419_vm10 = vcmp.lt.f32.partialorder %v418_v6, 0.0004427343 }
 0x1be   : > { %v417_v9 = vmul.f32 %v640_v60, %v416_v3 }
 0x20d   : > { %v377_v46 = vpop.xlane.xlu0 %376 }
 0x20e   : > { %vm381_vm8 = vcmp.ge.f32.partialorder %v377_v46, 0.5 }
 0x20f   : > { %v429_v47 = vsel %vm381_vm8, %v836_v27, %v424_v45 }
 0x210   : > { %433 = vrot.lane.b32.xlu0 %v429_v47, %s730_s25 }
 0x215   : > { %v380_v48 = vpop.xlane.xlu1 %379 }
 0x216   : > { %vm382_vm9 = vcmp.ge.f32.partialorder %v380_v48, 0.5 }
 0x217   : > { %v430_v49 = vsel %vm382_vm9, %v833_v18, %v426_v44 }
 0x218   : > { %435 = vrot.lane.b32.xlu2 %v430_v49, %s730_s25 }
 0x22d   : > { %v386_v52 = vpop.permute.xlu1 %385 }
 0x22e   : > { %v393_v53 = vsub.f32 %v836_v27, %v386_v52  ;;  %v391_v22 = vmax.f32 %v836_v27, %v386_v52 }
 0x230   : > { %v395_v55 = vand.u32 2147483647, %v393_v53 }
 0x232   : > { %v397_v57 = vsub.f32 0.0, %v395_v55 }
 0x234   : > { %v399_v59 = vmul.f32 1.442695, %v397_v57 }
 0x236   : > { %641 = vpow2.f32 %v399_v59 }
 0x237   : > { %643 = vlog2.f32 %v412_v61 }
 0x23c   : > { %v642_v62 = vpop.eup %641 }
 0x23d   : > { %v403_v1 = vadd.f32 1.0, %v642_v62  ;;  %v406_v4 = vmul.f32 -0.5, %v642_v62  ;;  %v644_v5 = vpop.eup %643  ;;  %v409_v12 = vand.u32 2147483647, %v642_v62 }
 0x23e   : > { %v414_v8 = vmul.f32 0.6931472, %v644_v5 }
 0x23f   : > { %645 = vlog2.f32 %v403_v1  ;;  %v407_v10 = vadd.f32 1.0, %v406_v4  ;;  %vm410_vm11 = vcmp.lt.f32.partialorder %v409_v12, 0.0004427343 }
 0x240   : > { %v420_v16 = vsel %vm419_vm10, %v417_v9, %v414_v8 }
 0x241   : > { %v408_v19 = vmul.f32 %v642_v62, %v407_v10  ;;  %v422_v0 = vadd.f32 %v420_v16, %v392_v14 }
 0x245   : > { %v646_v11 = vpop.eup %645 }
 0x246   : > { %v405_v17 = vmul.f32 0.6931472, %v646_v11 }
 0x248   : > { %v411_v24 = vsel %vm410_vm11, %v408_v19, %v405_v17 }
 0x249   : > { %v421_v26 = vadd.f32 %v411_v24, %v391_v22 }
 0x272   : > { %v436_v21 = vpop.permute.xlu2 %435 }
 0x273   : > { %v440_v25 = vsub.f32 %v422_v0, %v436_v21 }
 0x275   : > { %v442_v18 = vsel %vm324_vm12, %v440_v25, 0.0 }
 0x276   : > { %v446_v31 = vsel %vm444_vm14, %v442_v18, 0.0 }
 0x282   : > { %v434_v28 = vpop.permute.xlu0 %433 }
 0x283   : > { %v439_v29 = vsub.f32 %v421_v26, %v434_v28 }
 0x285   : > { %v441_v30 = vsel %vm323_vm13, %v439_v29, 0.0 }
 0x286   : > { %v445_v32 = vsel %vm444_vm14, %v441_v30, 0.0 }
 0x287   : > { %v447_v33 = vadd.f32 %v446_v31, %v445_v32 }
 0x289   : > { %v448_v34 = vrot.slane %v447_v33, 4 }
 0x28b   : > { %v449_v35 = vadd.f32 %v448_v34, %v447_v33 }
 0x28d   : > { %v450_v27 = vrot.slane %v449_v35, 2 }
 0x28f   : > { %v451_v36 = vadd.f32 %v450_v27, %v449_v35 }
 0x291   : > { %v452_v37 = vrot.slane %v451_v36, 1 }
 0x293   : > { %v453_v38 = vadd.f32 %v452_v37, %v451_v36 }
 0x295   : > { %456 = vperm.xlu1 %637, %v453_v38  }
 0x307   : > { %v457_v39 = vpop.permute.xlu1 %456 }
 0x308   : > { %460 = vst [vmem:[%s301_s30] sm:$0xff] %v457_v39 }
 0x309 PF: > { %s16_s16 = sadd.s32 1, %s724_s16   ;;  %s886_s12 = smov %s712_s13 }
 0x30a   : > { %p13_p7 = scmp.ge.s32.totalorder %s16_s16, 4   ;;  %s870_s13 = smov 0  }
 0x30b   : > { %s887_s14 = smov %s720_s15  ;;  %s888_s15 = smov %s890_s18 }
 0x30c   :  { %15 = sbr.rel (!%p13_p7) target bundleno = 4 (0x4), region = 82 }
 0x311   :  { %480 = vsyncpa [#allocation3], 1 }
 0x312   :  { %482 = vsyncpa [#allocation3 + $0x1], 1 }

</bundles_post_ra>
